<compile_context>
chip_gen: v7x
topology: tpu7x:2x2x1
jax: 0.10.0
libtpu: 0.0.40
codegen_flags: <defaults>
</compile_context>

<pallas_src>
import functools

import jax
import jax.numpy as jnp
from jax.experimental import pallas as pl
from jax.experimental.pallas import tpu as pltpu


def _pick_layout(hw):
    """Pick (S_pad, L, TS): lane width L=128, sublane tile TS (multiple of 8, up to
    512 per the perf review) and the padded sublane extent S_pad (multiple of TS).
    Awkward H*W sizes are padded (and masked in-kernel) instead of falling back to
    a 1-sublane layout."""
    L = 128
    s_raw = pl.cdiv(hw, L)
    for ts in (512, 256, 128, 64, 32, 16, 8):
        s_pad = pl.cdiv(s_raw, ts) * ts
        # accept the largest tile whose padding overhead stays small
        if ts == 8 or (s_pad - s_raw) <= max(s_raw // 8, 8):
            return s_pad, L, ts
    raise AssertionError("unreachable")


def _segment_offset_kernel(ps_ref, po_ref, to_ref, ts_ref,                # inputs
                           bce_ref, int_ref, pp_ref, tt_ref,              # (C,8,128)
                           sl1_ref, cnt_ref, disp_ref,                    # (1,8,128)
                           *, eps, hw, ts_tile, lanes, split,
                           tiles_per_split, needs_mask):
    s = pl.program_id(1)

    # Outputs double as accumulators (same block across the spatial grid axis).
    @pl.when(s == 0)
    def _init():
        for r in (bce_ref, int_ref, pp_ref, tt_ref, sl1_ref, cnt_ref, disp_ref):
            r[...] = jnp.zeros_like(r)

    n_classes = ps_ref.shape[0]

    lbl = ts_ref[0].astype(jnp.float32)      # (TS, L) label plane
    lbl_i = lbl.astype(jnp.int32)            # truncation, like tensor.long()

    if needs_mask:
        g = pl.program_id(0)
        blk = (g % split) * tiles_per_split + s if split > 1 else s
        row = blk * ts_tile + jax.lax.broadcasted_iota(jnp.int32, (ts_tile, lanes), 0)
        lane = jax.lax.broadcasted_iota(jnp.int32, (ts_tile, lanes), 1)
        valid = ((row * lanes + lane) < hw).astype(jnp.float32)   # (TS, L)
    else:
        valid = None

    def fold(a):
        """(TS, L) -> (8, L): sublane-group fold.  Static, tile-aligned slices ->
        pure vreg-wise VPU adds; the cross-lane reduction is deferred to JAX."""
        acc = a[0:8]
        for i in range(1, ts_tile // 8):
            acc = acc + a[i * 8:(i + 1) * 8]
        return acc

    # ---- per-channel BCE + Dice partial sums (one-hot built in-kernel) ----------
    for k in range(n_classes):
        xk = ps_ref[k].astype(jnp.float32)          # (TS, L) probabilities
        tk = (lbl_i == k).astype(jnp.float32)       # one-hot plane for class k
        logp = jnp.maximum(jnp.log(xk), -100.0)     # nn.BCELoss log clamp
        log1mp = jnp.maximum(jnp.log(1.0 - xk), -100.0)
        bce_el = -jnp.where(tk > 0.5, logp, log1mp)
        pk = jax.nn.sigmoid(xk)                     # DiceLoss re-applies sigmoid
        ptk = pk * tk
        ppk = pk * pk
        if needs_mask:
            bce_el = bce_el * valid
            ptk = ptk * valid
            ppk = ppk * valid
            tk = tk * valid
        bce_ref[k] = bce_ref[k] + fold(bce_el)
        int_ref[k] = int_ref[k] + fold(ptk)
        pp_ref[k] = pp_ref[k] + fold(ppk)
        tt_ref[k] = tt_ref[k] + fold(tk)            # t*t == t for a one-hot target

    # ---- SmoothL1 + displacement partial sums over positive voxels --------------
    po = po_ref[...].astype(jnp.float32)            # (Doff, TS, L)
    tg = to_ref[...].astype(jnp.float32)
    pos = (lbl > 0.0).astype(jnp.float32)           # padded labels are 0 -> excluded

    d = po - tg
    ad = jnp.abs(d)
    sl1 = jnp.where(ad < 1.0, 0.5 * d * d, ad - 0.5)        # SmoothL1, beta=1
    sl1_pos = jnp.sum(sl1, axis=0) * pos                    # (TS, L)

    # sqrt-free cosine: cos^2 = dot^2 / ((|po|^2+eps^2)(|tg|^2+eps^2)).
    # (epsilon semantics differ from (|v|+eps) only for near-zero-norm vectors.)
    nsq_p = jnp.sum(po * po, axis=0)
    nsq_t = jnp.sum(tg * tg, axis=0)
    dot = jnp.sum(po * tg, axis=0)
    cos2 = (dot * dot) / ((nsq_p + eps * eps) * (nsq_t + eps * eps))
    disp_el = (1.0 - cos2) * pos

    sl1_ref[0] = sl1_ref[0] + fold(sl1_pos)
    cnt_ref[0] = cnt_ref[0] + fold(pos)
    disp_ref[0] = disp_ref[0] + fold(disp_el)


def segment_offset_loss(pred_seg, pred_offset, target_seg, target_offset, *,
                        alpha=0.5, beta=100.0, dice_alpha=0.5, dice_beta=0.5,
                        epsilon=1e-6):
    """JAX/Pallas forward of SegmentOffsetLoss -> {'seg','offset','displacement'}."""
    N, C, H, W = pred_seg.shape
    Doff = pred_offset.shape[1]
    assert pred_offset.shape == target_offset.shape
    assert target_seg.shape[0] == N and target_seg.shape[2:] == (H, W)

    t_seg = target_seg[:, 0:1]        # label plane; 'mask' channel unused by forward

    HW = H * W
    S_pad, L, TS = _pick_layout(HW)
    pad = S_pad * L - HW
    needs_mask = pad != 0

    def _prep(a, ch):
        # Contiguous NCHW -> (N, ch, S_pad, L): reshape only (no HBM transpose);
        # a small tail pad is added for awkward spatial sizes and masked in-kernel.
        a2 = a.reshape(N, ch, HW)
        if pad:
            a2 = jnp.pad(a2, ((0, 0), (0, 0), (0, pad)))
        return a2.reshape(N, ch, S_pad, L)

    ps4 = _prep(pred_seg, C)
    po4 = _prep(pred_offset, Doff)
    to4 = _prep(target_offset, Doff)
    ts4 = _prep(t_seg, 1)

    tiles_total = S_pad // TS
    # v7x: when N == 1 split the spatial reduction in two so both TensorCores work.
    split = 2 if (N == 1 and tiles_total >= 2 and tiles_total % 2 == 0) else 1
    tps = tiles_total // split
    G = N * split

    if split == 1:
        in_map = lambda g, s: (g, 0, s, 0)
    else:
        in_map = lambda g, s: (g // split, 0, (g % split) * tps + s, 0)
    out_map = lambda g, s: (g, 0, 0, 0)

    kernel = functools.partial(
        _segment_offset_kernel, eps=float(epsilon), hw=HW, ts_tile=TS, lanes=L,
        split=split, tiles_per_split=tps, needs_mask=needs_mask)

    seg_stat = jax.ShapeDtypeStruct((G, C, 8, L), jnp.float32)
    off_stat = jax.ShapeDtypeStruct((G, 1, 8, L), jnp.float32)

    outs = pl.pallas_call(
        kernel,
        out_shape=(seg_stat, seg_stat, seg_stat, seg_stat,
                   off_stat, off_stat, off_stat),
        grid_spec=pltpu.PrefetchScalarGridSpec(
            num_scalar_prefetch=0,
            grid=(G, tps),
            in_specs=[
                pl.BlockSpec((None, C, TS, L), in_map),
                pl.BlockSpec((None, Doff, TS, L), in_map),
                pl.BlockSpec((None, Doff, TS, L), in_map),
                pl.BlockSpec((None, 1, TS, L), in_map),
            ],
            out_specs=[
                pl.BlockSpec((None, C, 8, L), out_map),     # BCE element sums
                pl.BlockSpec((None, C, 8, L), out_map),     # sum p*t
                pl.BlockSpec((None, C, 8, L), out_map),     # sum p*p
                pl.BlockSpec((None, C, 8, L), out_map),     # sum t*t
                pl.BlockSpec((None, 1, 8, L), out_map),     # SmoothL1 masked sum
                pl.BlockSpec((None, 1, 8, L), out_map),     # positive-voxel count
                pl.BlockSpec((None, 1, 8, L), out_map),     # displacement masked sum
            ]),
        compiler_params=pltpu.CompilerParams(
            dimension_semantics=("parallel", "arbitrary"),
            vmem_limit_bytes=32 * 1024 * 1024),
    )(ps4, po4, to4, ts4)

    bce_p, int_p, pp_p, tt_p, sl1_p, cnt_p, disp_p = outs

    # ---- tiny O(C) cross-lane combine in plain JAX ----
    bce = jnp.sum(bce_p) / float(N * C * H * W)
    intersect = jnp.sum(int_p, axis=(0, 2, 3))                       # (C,)
    denom = jnp.maximum(jnp.sum(pp_p, axis=(0, 2, 3))
                        + jnp.sum(tt_p, axis=(0, 2, 3)), epsilon)
    dice_loss = 1.0 - jnp.mean(2.0 * intersect / denom)
    seg = alpha * (dice_alpha * bce + dice_beta * dice_loss)

    sl1_sum = jnp.sum(sl1_p)
    pos_cnt = jnp.sum(cnt_p)
    disp_sum = jnp.sum(disp_p)
    offset = beta * sl1_sum / (pos_cnt * float(Doff))   # mean over Doff * num_pos picks
    displacement = disp_sum / pos_cnt                   # NaN if no positives (as PyTorch)
    return {"seg": seg, "offset": offset, "displacement": displacement}


def _reference_jax(pred_seg, pred_offset, target_seg, target_offset,
                   alpha=0.5, beta=100.0):
    """Pure-JAX mirror of the PyTorch module, for the self-check."""
    eps = 1e-6
    n_classes = pred_seg.shape[1]
    t_seg = target_seg[:, 0:1]
    onehot = jax.nn.one_hot(t_seg[:, 0].astype(jnp.int32), n_classes,
                            axis=1, dtype=jnp.float32)              # (N, C, H, W)

    # BCEDiceLoss(alpha=0.5, beta=0.5)
    x = pred_seg.astype(jnp.float32)
    logp = jnp.maximum(jnp.log(x), -100.0)
    log1mp = jnp.maximum(jnp.log(1.0 - x), -100.0)
    bce = jnp.mean(-(onehot * logp + (1.0 - onehot) * log1mp))
    p = jax.nn.sigmoid(x)
    pf = jnp.transpose(p, (1, 0, 2, 3)).reshape(n_classes, -1)
    tf = jnp.transpose(onehot, (1, 0, 2, 3)).reshape(n_classes, -1)
    dice = 2.0 * jnp.sum(pf * tf, -1) / jnp.maximum(
        jnp.sum(pf * pf, -1) + jnp.sum(tf * tf, -1), eps)
    seg = alpha * (0.5 * bce + 0.5 * (1.0 - jnp.mean(dice)))

    pos = t_seg > 0
    posb = jnp.broadcast_to(pos, pred_offset.shape)
    d = pred_offset - target_offset
    ad = jnp.abs(d)
    sl1 = jnp.where(ad < 1.0, 0.5 * d * d, ad - 0.5)
    offset = beta * jnp.sum(jnp.where(posb, sl1, 0.0)) / jnp.sum(posb)

    pn = jnp.sqrt(jnp.sum(pred_offset ** 2, axis=1, keepdims=True)) + eps
    tn = jnp.sqrt(jnp.sum(target_offset ** 2, axis=1, keepdims=True)) + eps
    dot = jnp.sum((pred_offset / pn) * (target_offset / tn), axis=1, keepdims=True)
    disp = jnp.sum(jnp.where(pos, 1.0 - dot ** 2, 0.0)) / jnp.sum(pos)
    return {"seg": seg, "offset": offset, "displacement": disp}


if __name__ == "__main__":
    ALPHA, BETA = 0.5, 100.0          # SegmentOffsetLoss defaults
    N, C, H, W, DOFF = 2, 4, 16, 16, 2

    key = jax.random.PRNGKey(0)
    k1, k2, k3, k4, k5 = jax.random.split(key, 5)

    # pred_seg must be probabilities (nn.BCELoss input).
    pred_seg = jax.nn.sigmoid(jax.random.normal(k1, (N, C, H, W), jnp.float32))
    pred_offset = jax.random.normal(k2, (N, DOFF, H, W), jnp.float32)
    target_offset = jax.random.normal(k3, (N, DOFF, H, W), jnp.float32)
    labels = jax.random.randint(k4, (N, 1, H, W), 0, C).astype(jnp.float32)
    mask = (jax.random.uniform(k5, (N, 1, H, W)) > 0.5).astype(jnp.float32)
    target_seg = jnp.concatenate([labels, mask], axis=1)        # (N, 2, H, W)

    loss_fn = jax.jit(functools.partial(segment_offset_loss, alpha=ALPHA, beta=BETA))
    out = jax.block_until_ready(loss_fn(pred_seg, pred_offset, target_seg,
                                        target_offset))

    ref = _reference_jax(pred_seg, pred_offset, target_seg, target_offset,
                         alpha=ALPHA, beta=BETA)
    for name in ("seg", "offset", "displacement"):
        assert jnp.allclose(out[name], ref[name], rtol=1e-4, atol=1e-5), (
            name, out[name], ref[name])

    print("KERNEL_OK")
</pallas_src>

<mosaic_0001>
module attributes {stable_mosaic.version = 11 : i64} {
  func.func @_segment_offset_kernel(%arg0: i32, %arg1: i32, %arg2: memref<1x4x8x128xf32, #tpu.memory_space<vmem>>, %arg3: memref<1x2x8x128xf32, #tpu.memory_space<vmem>>, %arg4: memref<1x2x8x128xf32, #tpu.memory_space<vmem>>, %arg5: memref<1x1x8x128xf32, #tpu.memory_space<vmem>>, %arg6: memref<1x4x8x128xf32, #tpu.memory_space<vmem>>, %arg7: memref<1x4x8x128xf32, #tpu.memory_space<vmem>>, %arg8: memref<1x4x8x128xf32, #tpu.memory_space<vmem>>, %arg9: memref<1x4x8x128xf32, #tpu.memory_space<vmem>>, %arg10: memref<1x1x8x128xf32, #tpu.memory_space<vmem>>, %arg11: memref<1x1x8x128xf32, #tpu.memory_space<vmem>>, %arg12: memref<1x1x8x128xf32, #tpu.memory_space<vmem>>) attributes {dimension_semantics = [#tpu.dimension_semantics<parallel>, #tpu.dimension_semantics<arbitrary>], iteration_bounds = array<i64: 2, 1>, scalar_prefetch = 0 : i64, scratch_operands = 0 : i64, tpu.core_type = #tpu.core_type<tc>, window_params = [{transform_indices = @transform_0, window_bounds = array<i64: 1, 4, 8, 128>}, {transform_indices = @transform_1, window_bounds = array<i64: 1, 2, 8, 128>}, {transform_indices = @transform_2, window_bounds = array<i64: 1, 2, 8, 128>}, {transform_indices = @transform_3, window_bounds = array<i64: 1, 1, 8, 128>}, {transform_indices = @transform_4, window_bounds = array<i64: 1, 4, 8, 128>}, {transform_indices = @transform_5, window_bounds = array<i64: 1, 4, 8, 128>}, {transform_indices = @transform_6, window_bounds = array<i64: 1, 4, 8, 128>}, {transform_indices = @transform_7, window_bounds = array<i64: 1, 4, 8, 128>}, {transform_indices = @transform_8, window_bounds = array<i64: 1, 1, 8, 128>}, {transform_indices = @transform_9, window_bounds = array<i64: 1, 1, 8, 128>}, {transform_indices = @transform_10, window_bounds = array<i64: 1, 1, 8, 128>}]} {
    %c0_i32 = arith.constant 0 : i32
    %0 = arith.cmpi eq, %arg1, %c0_i32 : i32
    %1 = arith.extui %0 : i1 to i32
    %c0_i32_0 = arith.constant 0 : i32
    %2 = arith.cmpi ne, %1, %c0_i32_0 : i32
    scf.if %2 {
      %cst_212 = arith.constant 0.000000e+00 : f32
      %288 = vector.broadcast %cst_212 : f32 to vector<4x8x128xf32>
      %c0_213 = arith.constant 0 : index
      %c0_214 = arith.constant 0 : index
      %c0_215 = arith.constant 0 : index
      %c0_216 = arith.constant 0 : index
      %289 = vector.load %arg6[%c0_213, %c0_214, %c0_215, %c0_216] : memref<1x4x8x128xf32, #tpu.memory_space<vmem>>, vector<1x4x8x128xf32>
      %290 = vector.shape_cast %289 : vector<1x4x8x128xf32> to vector<4x8x128xf32>
      %291 = vector.shape_cast %288 : vector<4x8x128xf32> to vector<1x4x8x128xf32>
      tpu.vector_store %arg6[%c0_213, %c0_214, %c0_215, %c0_216], %291 {strides = array<i32>} : memref<1x4x8x128xf32, #tpu.memory_space<vmem>>, vector<1x4x8x128xf32>,
      %cst_217 = arith.constant 0.000000e+00 : f32
      %292 = vector.broadcast %cst_217 : f32 to vector<4x8x128xf32>
      %c0_218 = arith.constant 0 : index
      %c0_219 = arith.constant 0 : index
      %c0_220 = arith.constant 0 : index
      %c0_221 = arith.constant 0 : index
      %293 = vector.load %arg7[%c0_218, %c0_219, %c0_220, %c0_221] : memref<1x4x8x128xf32, #tpu.memory_space<vmem>>, vector<1x4x8x128xf32>
      %294 = vector.shape_cast %293 : vector<1x4x8x128xf32> to vector<4x8x128xf32>
      %295 = vector.shape_cast %292 : vector<4x8x128xf32> to vector<1x4x8x128xf32>
      tpu.vector_store %arg7[%c0_218, %c0_219, %c0_220, %c0_221], %295 {strides = array<i32>} : memref<1x4x8x128xf32, #tpu.memory_space<vmem>>, vector<1x4x8x128xf32>,
      %cst_222 = arith.constant 0.000000e+00 : f32
      %296 = vector.broadcast %cst_222 : f32 to vector<4x8x128xf32>
      %c0_223 = arith.constant 0 : index
      %c0_224 = arith.constant 0 : index
      %c0_225 = arith.constant 0 : index
      %c0_226 = arith.constant 0 : index
      %297 = vector.load %arg8[%c0_223, %c0_224, %c0_225, %c0_226] : memref<1x4x8x128xf32, #tpu.memory_space<vmem>>, vector<1x4x8x128xf32>
      %298 = vector.shape_cast %297 : vector<1x4x8x128xf32> to vector<4x8x128xf32>
      %299 = vector.shape_cast %296 : vector<4x8x128xf32> to vector<1x4x8x128xf32>
      tpu.vector_store %arg8[%c0_223, %c0_224, %c0_225, %c0_226], %299 {strides = array<i32>} : memref<1x4x8x128xf32, #tpu.memory_space<vmem>>, vector<1x4x8x128xf32>,
      %cst_227 = arith.constant 0.000000e+00 : f32
      %300 = vector.broadcast %cst_227 : f32 to vector<4x8x128xf32>
      %c0_228 = arith.constant 0 : index
      %c0_229 = arith.constant 0 : index
      %c0_230 = arith.constant 0 : index
      %c0_231 = arith.constant 0 : index
      %301 = vector.load %arg9[%c0_228, %c0_229, %c0_230, %c0_231] : memref<1x4x8x128xf32, #tpu.memory_space<vmem>>, vector<1x4x8x128xf32>
      %302 = vector.shape_cast %301 : vector<1x4x8x128xf32> to vector<4x8x128xf32>
      %303 = vector.shape_cast %300 : vector<4x8x128xf32> to vector<1x4x8x128xf32>
      tpu.vector_store %arg9[%c0_228, %c0_229, %c0_230, %c0_231], %303 {strides = array<i32>} : memref<1x4x8x128xf32, #tpu.memory_space<vmem>>, vector<1x4x8x128xf32>,
      %cst_232 = arith.constant 0.000000e+00 : f32
      %304 = vector.broadcast %cst_232 : f32 to vector<1x8x128xf32>
      %c0_233 = arith.constant 0 : index
      %c0_234 = arith.constant 0 : index
      %c0_235 = arith.constant 0 : index
      %c0_236 = arith.constant 0 : index
      %305 = vector.load %arg10[%c0_233, %c0_234, %c0_235, %c0_236] : memref<1x1x8x128xf32, #tpu.memory_space<vmem>>, vector<1x1x8x128xf32>
      %306 = vector.shape_cast %305 : vector<1x1x8x128xf32> to vector<1x8x128xf32>
      %307 = vector.shape_cast %304 : vector<1x8x128xf32> to vector<1x1x8x128xf32>
      tpu.vector_store %arg10[%c0_233, %c0_234, %c0_235, %c0_236], %307 {strides = array<i32>} : memref<1x1x8x128xf32, #tpu.memory_space<vmem>>, vector<1x1x8x128xf32>,
      %cst_237 = arith.constant 0.000000e+00 : f32
      %308 = vector.broadcast %cst_237 : f32 to vector<1x8x128xf32>
      %c0_238 = arith.constant 0 : index
      %c0_239 = arith.constant 0 : index
      %c0_240 = arith.constant 0 : index
      %c0_241 = arith.constant 0 : index
      %309 = vector.load %arg11[%c0_238, %c0_239, %c0_240, %c0_241] : memref<1x1x8x128xf32, #tpu.memory_space<vmem>>, vector<1x1x8x128xf32>
      %310 = vector.shape_cast %309 : vector<1x1x8x128xf32> to vector<1x8x128xf32>
      %311 = vector.shape_cast %308 : vector<1x8x128xf32> to vector<1x1x8x128xf32>
      tpu.vector_store %arg11[%c0_238, %c0_239, %c0_240, %c0_241], %311 {strides = array<i32>} : memref<1x1x8x128xf32, #tpu.memory_space<vmem>>, vector<1x1x8x128xf32>,
      %cst_242 = arith.constant 0.000000e+00 : f32
      %312 = vector.broadcast %cst_242 : f32 to vector<1x8x128xf32>
      %c0_243 = arith.constant 0 : index
      %c0_244 = arith.constant 0 : index
      %c0_245 = arith.constant 0 : index
      %c0_246 = arith.constant 0 : index
      %313 = vector.load %arg12[%c0_243, %c0_244, %c0_245, %c0_246] : memref<1x1x8x128xf32, #tpu.memory_space<vmem>>, vector<1x1x8x128xf32>
      %314 = vector.shape_cast %313 : vector<1x1x8x128xf32> to vector<1x8x128xf32>
      %315 = vector.shape_cast %312 : vector<1x8x128xf32> to vector<1x1x8x128xf32>
      tpu.vector_store %arg12[%c0_243, %c0_244, %c0_245, %c0_246], %315 {strides = array<i32>} : memref<1x1x8x128xf32, #tpu.memory_space<vmem>>, vector<1x1x8x128xf32>,
    } else {
    }
    %c0 = arith.constant 0 : index
    %c0_1 = arith.constant 0 : index
    %c0_2 = arith.constant 0 : index
    %c0_3 = arith.constant 0 : index
    %3 = vector.load %arg5[%c0, %c0_1, %c0_2, %c0_3] : memref<1x1x8x128xf32, #tpu.memory_space<vmem>>, vector<1x1x8x128xf32>
    %4 = vector.shape_cast %3 : vector<1x1x8x128xf32> to vector<8x128xf32>
    %5 = arith.fptosi %4 : vector<8x128xf32> to vector<8x128xi32>
    %c8_i32 = arith.constant 8 : i32
    %6 = arith.muli %arg1, %c8_i32 : i32
    %7 = tpu.iota {dimensions = array<i32: 0>} : vector<8x128xi32>
    %8 = vector.broadcast %6 : i32 to vector<8x128xi32>
    %9 = arith.addi %8, %7 : vector<8x128xi32>
    %10 = tpu.iota {dimensions = array<i32: 1>} : vector<8x128xi32>
    %c128_i32 = arith.constant 128 : i32
    %11 = vector.broadcast %c128_i32 : i32 to vector<8x128xi32>
    %12 = arith.muli %9, %11 : vector<8x128xi32>
    %13 = arith.addi %12, %10 : vector<8x128xi32>
    %c256_i32 = arith.constant 256 : i32
    %14 = vector.broadcast %c256_i32 : i32 to vector<8x128xi32>
    %15 = arith.cmpi slt, %13, %14 : vector<8x128xi32>
    %16 = arith.extui %15 : vector<8x128xi1> to vector<8x128xi32>
    %17 = arith.sitofp %16 : vector<8x128xi32> to vector<8x128xf32>
    %c0_4 = arith.constant 0 : index
    %c0_5 = arith.constant 0 : index
    %c0_6 = arith.constant 0 : index
    %c0_7 = arith.constant 0 : index
    %18 = vector.load %arg2[%c0_4, %c0_5, %c0_6, %c0_7] : memref<1x4x8x128xf32, #tpu.memory_space<vmem>>, vector<1x1x8x128xf32>
    %19 = vector.shape_cast %18 : vector<1x1x8x128xf32> to vector<8x128xf32>
    %c0_i32_8 = arith.constant 0 : i32
    %20 = vector.broadcast %c0_i32_8 : i32 to vector<8x128xi32>
    %21 = arith.cmpi eq, %5, %20 : vector<8x128xi32>
    %22 = arith.extui %21 : vector<8x128xi1> to vector<8x128xi32>
    %23 = arith.sitofp %22 : vector<8x128xi32> to vector<8x128xf32>
    %24 = math.log %19 : vector<8x128xf32>
    %cst = arith.constant -1.000000e+02 : f32
    %25 = vector.broadcast %cst : f32 to vector<8x128xf32>
    %26 = arith.maximumf %24, %25 : vector<8x128xf32>
    %cst_9 = arith.constant 1.000000e+00 : f32
    %27 = vector.broadcast %cst_9 : f32 to vector<8x128xf32>
    %28 = arith.subf %27, %19 : vector<8x128xf32>
    %29 = math.log %28 : vector<8x128xf32>
    %cst_10 = arith.constant -1.000000e+02 : f32
    %30 = vector.broadcast %cst_10 : f32 to vector<8x128xf32>
    %31 = arith.maximumf %29, %30 : vector<8x128xf32>
    %cst_11 = arith.constant 5.000000e-01 : f32
    %32 = vector.broadcast %cst_11 : f32 to vector<8x128xf32>
    %33 = arith.cmpf ogt, %23, %32 : vector<8x128xf32>
    %34 = arith.select %33, %26, %31 : vector<8x128xi1>, vector<8x128xf32>
    %cst_12 = arith.constant 0.000000e+00 : f32
    %35 = vector.broadcast %cst_12 : f32 to vector<8x128xf32>
    %36 = arith.subf %35, %34 : vector<8x128xf32>
    %37 = arith.negf %19 : vector<8x128xf32>
    %38 = math.exp %37 : vector<8x128xf32>
    %cst_13 = arith.constant 1.000000e+00 : f32
    %39 = vector.broadcast %cst_13 : f32 to vector<8x128xf32>
    %40 = arith.addf %39, %38 : vector<8x128xf32>
    %41 = arith.divf %39, %40 : vector<8x128xf32>
    %42 = arith.mulf %41, %23 : vector<8x128xf32>
    %43 = arith.mulf %41, %41 : vector<8x128xf32>
    %44 = arith.mulf %36, %17 : vector<8x128xf32>
    %45 = arith.mulf %42, %17 : vector<8x128xf32>
    %46 = arith.mulf %43, %17 : vector<8x128xf32>
    %47 = arith.mulf %23, %17 : vector<8x128xf32>
    %c0_14 = arith.constant 0 : index
    %c0_15 = arith.constant 0 : index
    %c0_16 = arith.constant 0 : index
    %c0_17 = arith.constant 0 : index
    %48 = vector.load %arg6[%c0_14, %c0_15, %c0_16, %c0_17] : memref<1x4x8x128xf32, #tpu.memory_space<vmem>>, vector<1x1x8x128xf32>
    %49 = vector.shape_cast %48 : vector<1x1x8x128xf32> to vector<8x128xf32>
    %50 = arith.addf %49, %44 : vector<8x128xf32>
    %c0_18 = arith.constant 0 : index
    %c0_19 = arith.constant 0 : index
    %c0_20 = arith.constant 0 : index
    %c0_21 = arith.constant 0 : index
    %51 = vector.load %arg6[%c0_18, %c0_19, %c0_20, %c0_21] : memref<1x4x8x128xf32, #tpu.memory_space<vmem>>, vector<1x1x8x128xf32>
    %52 = vector.shape_cast %51 : vector<1x1x8x128xf32> to vector<8x128xf32>
    %53 = vector.shape_cast %50 : vector<8x128xf32> to vector<1x1x8x128xf32>
    tpu.vector_store %arg6[%c0_18, %c0_19, %c0_20, %c0_21], %53 {strides = array<i32>} : memref<1x4x8x128xf32, #tpu.memory_space<vmem>>, vector<1x1x8x128xf32>,
    %c0_22 = arith.constant 0 : index
    %c0_23 = arith.constant 0 : index
    %c0_24 = arith.constant 0 : index
    %c0_25 = arith.constant 0 : index
    %54 = vector.load %arg7[%c0_22, %c0_23, %c0_24, %c0_25] : memref<1x4x8x128xf32, #tpu.memory_space<vmem>>, vector<1x1x8x128xf32>
    %55 = vector.shape_cast %54 : vector<1x1x8x128xf32> to vector<8x128xf32>
    %56 = arith.addf %55, %45 : vector<8x128xf32>
    %c0_26 = arith.constant 0 : index
    %c0_27 = arith.constant 0 : index
    %c0_28 = arith.constant 0 : index
    %c0_29 = arith.constant 0 : index
    %57 = vector.load %arg7[%c0_26, %c0_27, %c0_28, %c0_29] : memref<1x4x8x128xf32, #tpu.memory_space<vmem>>, vector<1x1x8x128xf32>
    %58 = vector.shape_cast %57 : vector<1x1x8x128xf32> to vector<8x128xf32>
    %59 = vector.shape_cast %56 : vector<8x128xf32> to vector<1x1x8x128xf32>
    tpu.vector_store %arg7[%c0_26, %c0_27, %c0_28, %c0_29], %59 {strides = array<i32>} : memref<1x4x8x128xf32, #tpu.memory_space<vmem>>, vector<1x1x8x128xf32>,
    %c0_30 = arith.constant 0 : index
    %c0_31 = arith.constant 0 : index
    %c0_32 = arith.constant 0 : index
    %c0_33 = arith.constant 0 : index
    %60 = vector.load %arg8[%c0_30, %c0_31, %c0_32, %c0_33] : memref<1x4x8x128xf32, #tpu.memory_space<vmem>>, vector<1x1x8x128xf32>
    %61 = vector.shape_cast %60 : vector<1x1x8x128xf32> to vector<8x128xf32>
    %62 = arith.addf %61, %46 : vector<8x128xf32>
    %c0_34 = arith.constant 0 : index
    %c0_35 = arith.constant 0 : index
    %c0_36 = arith.constant 0 : index
    %c0_37 = arith.constant 0 : index
    %63 = vector.load %arg8[%c0_34, %c0_35, %c0_36, %c0_37] : memref<1x4x8x128xf32, #tpu.memory_space<vmem>>, vector<1x1x8x128xf32>
    %64 = vector.shape_cast %63 : vector<1x1x8x128xf32> to vector<8x128xf32>
    %65 = vector.shape_cast %62 : vector<8x128xf32> to vector<1x1x8x128xf32>
    tpu.vector_store %arg8[%c0_34, %c0_35, %c0_36, %c0_37], %65 {strides = array<i32>} : memref<1x4x8x128xf32, #tpu.memory_space<vmem>>, vector<1x1x8x128xf32>,
    %c0_38 = arith.constant 0 : index
    %c0_39 = arith.constant 0 : index
    %c0_40 = arith.constant 0 : index
    %c0_41 = arith.constant 0 : index
    %66 = vector.load %arg9[%c0_38, %c0_39, %c0_40, %c0_41] : memref<1x4x8x128xf32, #tpu.memory_space<vmem>>, vector<1x1x8x128xf32>
    %67 = vector.shape_cast %66 : vector<1x1x8x128xf32> to vector<8x128xf32>
    %68 = arith.addf %67, %47 : vector<8x128xf32>
    %c0_42 = arith.constant 0 : index
    %c0_43 = arith.constant 0 : index
    %c0_44 = arith.constant 0 : index
    %c0_45 = arith.constant 0 : index
    %69 = vector.load %arg9[%c0_42, %c0_43, %c0_44, %c0_45] : memref<1x4x8x128xf32, #tpu.memory_space<vmem>>, vector<1x1x8x128xf32>
    %70 = vector.shape_cast %69 : vector<1x1x8x128xf32> to vector<8x128xf32>
    %71 = vector.shape_cast %68 : vector<8x128xf32> to vector<1x1x8x128xf32>
    tpu.vector_store %arg9[%c0_42, %c0_43, %c0_44, %c0_45], %71 {strides = array<i32>} : memref<1x4x8x128xf32, #tpu.memory_space<vmem>>, vector<1x1x8x128xf32>,
    %c0_46 = arith.constant 0 : index
    %c1 = arith.constant 1 : index
    %c0_47 = arith.constant 0 : index
    %c0_48 = arith.constant 0 : index
    %72 = vector.load %arg2[%c0_46, %c1, %c0_47, %c0_48] : memref<1x4x8x128xf32, #tpu.memory_space<vmem>>, vector<1x1x8x128xf32>
    %73 = vector.shape_cast %72 : vector<1x1x8x128xf32> to vector<8x128xf32>
    %c1_i32 = arith.constant 1 : i32
    %74 = vector.broadcast %c1_i32 : i32 to vector<8x128xi32>
    %75 = arith.cmpi eq, %5, %74 : vector<8x128xi32>
    %76 = arith.extui %75 : vector<8x128xi1> to vector<8x128xi32>
    %77 = arith.sitofp %76 : vector<8x128xi32> to vector<8x128xf32>
    %78 = math.log %73 : vector<8x128xf32>
    %cst_49 = arith.constant -1.000000e+02 : f32
    %79 = vector.broadcast %cst_49 : f32 to vector<8x128xf32>
    %80 = arith.maximumf %78, %79 : vector<8x128xf32>
    %cst_50 = arith.constant 1.000000e+00 : f32
    %81 = vector.broadcast %cst_50 : f32 to vector<8x128xf32>
    %82 = arith.subf %81, %73 : vector<8x128xf32>
    %83 = math.log %82 : vector<8x128xf32>
    %cst_51 = arith.constant -1.000000e+02 : f32
    %84 = vector.broadcast %cst_51 : f32 to vector<8x128xf32>
    %85 = arith.maximumf %83, %84 : vector<8x128xf32>
    %cst_52 = arith.constant 5.000000e-01 : f32
    %86 = vector.broadcast %cst_52 : f32 to vector<8x128xf32>
    %87 = arith.cmpf ogt, %77, %86 : vector<8x128xf32>
    %88 = arith.select %87, %80, %85 : vector<8x128xi1>, vector<8x128xf32>
    %cst_53 = arith.constant 0.000000e+00 : f32
    %89 = vector.broadcast %cst_53 : f32 to vector<8x128xf32>
    %90 = arith.subf %89, %88 : vector<8x128xf32>
    %91 = arith.negf %73 : vector<8x128xf32>
    %92 = math.exp %91 : vector<8x128xf32>
    %cst_54 = arith.constant 1.000000e+00 : f32
    %93 = vector.broadcast %cst_54 : f32 to vector<8x128xf32>
    %94 = arith.addf %93, %92 : vector<8x128xf32>
    %95 = arith.divf %93, %94 : vector<8x128xf32>
    %96 = arith.mulf %95, %77 : vector<8x128xf32>
    %97 = arith.mulf %95, %95 : vector<8x128xf32>
    %98 = arith.mulf %90, %17 : vector<8x128xf32>
    %99 = arith.mulf %96, %17 : vector<8x128xf32>
    %100 = arith.mulf %97, %17 : vector<8x128xf32>
    %101 = arith.mulf %77, %17 : vector<8x128xf32>
    %c0_55 = arith.constant 0 : index
    %c1_56 = arith.constant 1 : index
    %c0_57 = arith.constant 0 : index
    %c0_58 = arith.constant 0 : index
    %102 = vector.load %arg6[%c0_55, %c1_56, %c0_57, %c0_58] : memref<1x4x8x128xf32, #tpu.memory_space<vmem>>, vector<1x1x8x128xf32>
    %103 = vector.shape_cast %102 : vector<1x1x8x128xf32> to vector<8x128xf32>
    %104 = arith.addf %103, %98 : vector<8x128xf32>
    %c0_59 = arith.constant 0 : index
    %c1_60 = arith.constant 1 : index
    %c0_61 = arith.constant 0 : index
    %c0_62 = arith.constant 0 : index
    %105 = vector.load %arg6[%c0_59, %c1_60, %c0_61, %c0_62] : memref<1x4x8x128xf32, #tpu.memory_space<vmem>>, vector<1x1x8x128xf32>
    %106 = vector.shape_cast %105 : vector<1x1x8x128xf32> to vector<8x128xf32>
    %107 = vector.shape_cast %104 : vector<8x128xf32> to vector<1x1x8x128xf32>
    tpu.vector_store %arg6[%c0_59, %c1_60, %c0_61, %c0_62], %107 {strides = array<i32>} : memref<1x4x8x128xf32, #tpu.memory_space<vmem>>, vector<1x1x8x128xf32>,
    %c0_63 = arith.constant 0 : index
    %c1_64 = arith.constant 1 : index
    %c0_65 = arith.constant 0 : index
    %c0_66 = arith.constant 0 : index
    %108 = vector.load %arg7[%c0_63, %c1_64, %c0_65, %c0_66] : memref<1x4x8x128xf32, #tpu.memory_space<vmem>>, vector<1x1x8x128xf32>
    %109 = vector.shape_cast %108 : vector<1x1x8x128xf32> to vector<8x128xf32>
    %110 = arith.addf %109, %99 : vector<8x128xf32>
    %c0_67 = arith.constant 0 : index
    %c1_68 = arith.constant 1 : index
    %c0_69 = arith.constant 0 : index
    %c0_70 = arith.constant 0 : index
    %111 = vector.load %arg7[%c0_67, %c1_68, %c0_69, %c0_70] : memref<1x4x8x128xf32, #tpu.memory_space<vmem>>, vector<1x1x8x128xf32>
    %112 = vector.shape_cast %111 : vector<1x1x8x128xf32> to vector<8x128xf32>
    %113 = vector.shape_cast %110 : vector<8x128xf32> to vector<1x1x8x128xf32>
    tpu.vector_store %arg7[%c0_67, %c1_68, %c0_69, %c0_70], %113 {strides = array<i32>} : memref<1x4x8x128xf32, #tpu.memory_space<vmem>>, vector<1x1x8x128xf32>,
    %c0_71 = arith.constant 0 : index
    %c1_72 = arith.constant 1 : index
    %c0_73 = arith.constant 0 : index
    %c0_74 = arith.constant 0 : index
    %114 = vector.load %arg8[%c0_71, %c1_72, %c0_73, %c0_74] : memref<1x4x8x128xf32, #tpu.memory_space<vmem>>, vector<1x1x8x128xf32>
    %115 = vector.shape_cast %114 : vector<1x1x8x128xf32> to vector<8x128xf32>
    %116 = arith.addf %115, %100 : vector<8x128xf32>
    %c0_75 = arith.constant 0 : index
    %c1_76 = arith.constant 1 : index
    %c0_77 = arith.constant 0 : index
    %c0_78 = arith.constant 0 : index
    %117 = vector.load %arg8[%c0_75, %c1_76, %c0_77, %c0_78] : memref<1x4x8x128xf32, #tpu.memory_space<vmem>>, vector<1x1x8x128xf32>
    %118 = vector.shape_cast %117 : vector<1x1x8x128xf32> to vector<8x128xf32>
    %119 = vector.shape_cast %116 : vector<8x128xf32> to vector<1x1x8x128xf32>
    tpu.vector_store %arg8[%c0_75, %c1_76, %c0_77, %c0_78], %119 {strides = array<i32>} : memref<1x4x8x128xf32, #tpu.memory_space<vmem>>, vector<1x1x8x128xf32>,
    %c0_79 = arith.constant 0 : index
    %c1_80 = arith.constant 1 : index
    %c0_81 = arith.constant 0 : index
    %c0_82 = arith.constant 0 : index
    %120 = vector.load %arg9[%c0_79, %c1_80, %c0_81, %c0_82] : memref<1x4x8x128xf32, #tpu.memory_space<vmem>>, vector<1x1x8x128xf32>
    %121 = vector.shape_cast %120 : vector<1x1x8x128xf32> to vector<8x128xf32>
    %122 = arith.addf %121, %101 : vector<8x128xf32>
    %c0_83 = arith.constant 0 : index
    %c1_84 = arith.constant 1 : index
    %c0_85 = arith.constant 0 : index
    %c0_86 = arith.constant 0 : index
    %123 = vector.load %arg9[%c0_83, %c1_84, %c0_85, %c0_86] : memref<1x4x8x128xf32, #tpu.memory_space<vmem>>, vector<1x1x8x128xf32>
    %124 = vector.shape_cast %123 : vector<1x1x8x128xf32> to vector<8x128xf32>
    %125 = vector.shape_cast %122 : vector<8x128xf32> to vector<1x1x8x128xf32>
    tpu.vector_store %arg9[%c0_83, %c1_84, %c0_85, %c0_86], %125 {strides = array<i32>} : memref<1x4x8x128xf32, #tpu.memory_space<vmem>>, vector<1x1x8x128xf32>,
    %c0_87 = arith.constant 0 : index
    %c2 = arith.constant 2 : index
    %c0_88 = arith.constant 0 : index
    %c0_89 = arith.constant 0 : index
    %126 = vector.load %arg2[%c0_87, %c2, %c0_88, %c0_89] : memref<1x4x8x128xf32, #tpu.memory_space<vmem>>, vector<1x1x8x128xf32>
    %127 = vector.shape_cast %126 : vector<1x1x8x128xf32> to vector<8x128xf32>
    %c2_i32 = arith.constant 2 : i32
    %128 = vector.broadcast %c2_i32 : i32 to vector<8x128xi32>
    %129 = arith.cmpi eq, %5, %128 : vector<8x128xi32>
    %130 = arith.extui %129 : vector<8x128xi1> to vector<8x128xi32>
    %131 = arith.sitofp %130 : vector<8x128xi32> to vector<8x128xf32>
    %132 = math.log %127 : vector<8x128xf32>
    %cst_90 = arith.constant -1.000000e+02 : f32
    %133 = vector.broadcast %cst_90 : f32 to vector<8x128xf32>
    %134 = arith.maximumf %132, %133 : vector<8x128xf32>
    %cst_91 = arith.constant 1.000000e+00 : f32
    %135 = vector.broadcast %cst_91 : f32 to vector<8x128xf32>
    %136 = arith.subf %135, %127 : vector<8x128xf32>
    %137 = math.log %136 : vector<8x128xf32>
    %cst_92 = arith.constant -1.000000e+02 : f32
    %138 = vector.broadcast %cst_92 : f32 to vector<8x128xf32>
    %139 = arith.maximumf %137, %138 : vector<8x128xf32>
    %cst_93 = arith.constant 5.000000e-01 : f32
    %140 = vector.broadcast %cst_93 : f32 to vector<8x128xf32>
    %141 = arith.cmpf ogt, %131, %140 : vector<8x128xf32>
    %142 = arith.select %141, %134, %139 : vector<8x128xi1>, vector<8x128xf32>
    %cst_94 = arith.constant 0.000000e+00 : f32
    %143 = vector.broadcast %cst_94 : f32 to vector<8x128xf32>
    %144 = arith.subf %143, %142 : vector<8x128xf32>
    %145 = arith.negf %127 : vector<8x128xf32>
    %146 = math.exp %145 : vector<8x128xf32>
    %cst_95 = arith.constant 1.000000e+00 : f32
    %147 = vector.broadcast %cst_95 : f32 to vector<8x128xf32>
    %148 = arith.addf %147, %146 : vector<8x128xf32>
    %149 = arith.divf %147, %148 : vector<8x128xf32>
    %150 = arith.mulf %149, %131 : vector<8x128xf32>
    %151 = arith.mulf %149, %149 : vector<8x128xf32>
    %152 = arith.mulf %144, %17 : vector<8x128xf32>
    %153 = arith.mulf %150, %17 : vector<8x128xf32>
    %154 = arith.mulf %151, %17 : vector<8x128xf32>
    %155 = arith.mulf %131, %17 : vector<8x128xf32>
    %c0_96 = arith.constant 0 : index
    %c2_97 = arith.constant 2 : index
    %c0_98 = arith.constant 0 : index
    %c0_99 = arith.constant 0 : index
    %156 = vector.load %arg6[%c0_96, %c2_97, %c0_98, %c0_99] : memref<1x4x8x128xf32, #tpu.memory_space<vmem>>, vector<1x1x8x128xf32>
    %157 = vector.shape_cast %156 : vector<1x1x8x128xf32> to vector<8x128xf32>
    %158 = arith.addf %157, %152 : vector<8x128xf32>
    %c0_100 = arith.constant 0 : index
    %c2_101 = arith.constant 2 : index
    %c0_102 = arith.constant 0 : index
    %c0_103 = arith.constant 0 : index
    %159 = vector.load %arg6[%c0_100, %c2_101, %c0_102, %c0_103] : memref<1x4x8x128xf32, #tpu.memory_space<vmem>>, vector<1x1x8x128xf32>
    %160 = vector.shape_cast %159 : vector<1x1x8x128xf32> to vector<8x128xf32>
    %161 = vector.shape_cast %158 : vector<8x128xf32> to vector<1x1x8x128xf32>
    tpu.vector_store %arg6[%c0_100, %c2_101, %c0_102, %c0_103], %161 {strides = array<i32>} : memref<1x4x8x128xf32, #tpu.memory_space<vmem>>, vector<1x1x8x128xf32>,
    %c0_104 = arith.constant 0 : index
    %c2_105 = arith.constant 2 : index
    %c0_106 = arith.constant 0 : index
    %c0_107 = arith.constant 0 : index
    %162 = vector.load %arg7[%c0_104, %c2_105, %c0_106, %c0_107] : memref<1x4x8x128xf32, #tpu.memory_space<vmem>>, vector<1x1x8x128xf32>
    %163 = vector.shape_cast %162 : vector<1x1x8x128xf32> to vector<8x128xf32>
    %164 = arith.addf %163, %153 : vector<8x128xf32>
    %c0_108 = arith.constant 0 : index
    %c2_109 = arith.constant 2 : index
    %c0_110 = arith.constant 0 : index
    %c0_111 = arith.constant 0 : index
    %165 = vector.load %arg7[%c0_108, %c2_109, %c0_110, %c0_111] : memref<1x4x8x128xf32, #tpu.memory_space<vmem>>, vector<1x1x8x128xf32>
    %166 = vector.shape_cast %165 : vector<1x1x8x128xf32> to vector<8x128xf32>
    %167 = vector.shape_cast %164 : vector<8x128xf32> to vector<1x1x8x128xf32>
    tpu.vector_store %arg7[%c0_108, %c2_109, %c0_110, %c0_111], %167 {strides = array<i32>} : memref<1x4x8x128xf32, #tpu.memory_space<vmem>>, vector<1x1x8x128xf32>,
    %c0_112 = arith.constant 0 : index
    %c2_113 = arith.constant 2 : index
    %c0_114 = arith.constant 0 : index
    %c0_115 = arith.constant 0 : index
    %168 = vector.load %arg8[%c0_112, %c2_113, %c0_114, %c0_115] : memref<1x4x8x128xf32, #tpu.memory_space<vmem>>, vector<1x1x8x128xf32>
    %169 = vector.shape_cast %168 : vector<1x1x8x128xf32> to vector<8x128xf32>
    %170 = arith.addf %169, %154 : vector<8x128xf32>
    %c0_116 = arith.constant 0 : index
    %c2_117 = arith.constant 2 : index
    %c0_118 = arith.constant 0 : index
    %c0_119 = arith.constant 0 : index
    %171 = vector.load %arg8[%c0_116, %c2_117, %c0_118, %c0_119] : memref<1x4x8x128xf32, #tpu.memory_space<vmem>>, vector<1x1x8x128xf32>
    %172 = vector.shape_cast %171 : vector<1x1x8x128xf32> to vector<8x128xf32>
    %173 = vector.shape_cast %170 : vector<8x128xf32> to vector<1x1x8x128xf32>
    tpu.vector_store %arg8[%c0_116, %c2_117, %c0_118, %c0_119], %173 {strides = array<i32>} : memref<1x4x8x128xf32, #tpu.memory_space<vmem>>, vector<1x1x8x128xf32>,
    %c0_120 = arith.constant 0 : index
    %c2_121 = arith.constant 2 : index
    %c0_122 = arith.constant 0 : index
    %c0_123 = arith.constant 0 : index
    %174 = vector.load %arg9[%c0_120, %c2_121, %c0_122, %c0_123] : memref<1x4x8x128xf32, #tpu.memory_space<vmem>>, vector<1x1x8x128xf32>
    %175 = vector.shape_cast %174 : vector<1x1x8x128xf32> to vector<8x128xf32>
    %176 = arith.addf %175, %155 : vector<8x128xf32>
    %c0_124 = arith.constant 0 : index
    %c2_125 = arith.constant 2 : index
    %c0_126 = arith.constant 0 : index
    %c0_127 = arith.constant 0 : index
    %177 = vector.load %arg9[%c0_124, %c2_125, %c0_126, %c0_127] : memref<1x4x8x128xf32, #tpu.memory_space<vmem>>, vector<1x1x8x128xf32>
    %178 = vector.shape_cast %177 : vector<1x1x8x128xf32> to vector<8x128xf32>
    %179 = vector.shape_cast %176 : vector<8x128xf32> to vector<1x1x8x128xf32>
    tpu.vector_store %arg9[%c0_124, %c2_125, %c0_126, %c0_127], %179 {strides = array<i32>} : memref<1x4x8x128xf32, #tpu.memory_space<vmem>>, vector<1x1x8x128xf32>,
    %c0_128 = arith.constant 0 : index
    %c3 = arith.constant 3 : index
    %c0_129 = arith.constant 0 : index
    %c0_130 = arith.constant 0 : index
    %180 = vector.load %arg2[%c0_128, %c3, %c0_129, %c0_130] : memref<1x4x8x128xf32, #tpu.memory_space<vmem>>, vector<1x1x8x128xf32>
    %181 = vector.shape_cast %180 : vector<1x1x8x128xf32> to vector<8x128xf32>
    %c3_i32 = arith.constant 3 : i32
    %182 = vector.broadcast %c3_i32 : i32 to vector<8x128xi32>
    %183 = arith.cmpi eq, %5, %182 : vector<8x128xi32>
    %184 = arith.extui %183 : vector<8x128xi1> to vector<8x128xi32>
    %185 = arith.sitofp %184 : vector<8x128xi32> to vector<8x128xf32>
    %186 = math.log %181 : vector<8x128xf32>
    %cst_131 = arith.constant -1.000000e+02 : f32
    %187 = vector.broadcast %cst_131 : f32 to vector<8x128xf32>
    %188 = arith.maximumf %186, %187 : vector<8x128xf32>
    %cst_132 = arith.constant 1.000000e+00 : f32
    %189 = vector.broadcast %cst_132 : f32 to vector<8x128xf32>
    %190 = arith.subf %189, %181 : vector<8x128xf32>
    %191 = math.log %190 : vector<8x128xf32>
    %cst_133 = arith.constant -1.000000e+02 : f32
    %192 = vector.broadcast %cst_133 : f32 to vector<8x128xf32>
    %193 = arith.maximumf %191, %192 : vector<8x128xf32>
    %cst_134 = arith.constant 5.000000e-01 : f32
    %194 = vector.broadcast %cst_134 : f32 to vector<8x128xf32>
    %195 = arith.cmpf ogt, %185, %194 : vector<8x128xf32>
    %196 = arith.select %195, %188, %193 : vector<8x128xi1>, vector<8x128xf32>
    %cst_135 = arith.constant 0.000000e+00 : f32
    %197 = vector.broadcast %cst_135 : f32 to vector<8x128xf32>
    %198 = arith.subf %197, %196 : vector<8x128xf32>
    %199 = arith.negf %181 : vector<8x128xf32>
    %200 = math.exp %199 : vector<8x128xf32>
    %cst_136 = arith.constant 1.000000e+00 : f32
    %201 = vector.broadcast %cst_136 : f32 to vector<8x128xf32>
    %202 = arith.addf %201, %200 : vector<8x128xf32>
    %203 = arith.divf %201, %202 : vector<8x128xf32>
    %204 = arith.mulf %203, %185 : vector<8x128xf32>
    %205 = arith.mulf %203, %203 : vector<8x128xf32>
    %206 = arith.mulf %198, %17 : vector<8x128xf32>
    %207 = arith.mulf %204, %17 : vector<8x128xf32>
    %208 = arith.mulf %205, %17 : vector<8x128xf32>
    %209 = arith.mulf %185, %17 : vector<8x128xf32>
    %c0_137 = arith.constant 0 : index
    %c3_138 = arith.constant 3 : index
    %c0_139 = arith.constant 0 : index
    %c0_140 = arith.constant 0 : index
    %210 = vector.load %arg6[%c0_137, %c3_138, %c0_139, %c0_140] : memref<1x4x8x128xf32, #tpu.memory_space<vmem>>, vector<1x1x8x128xf32>
    %211 = vector.shape_cast %210 : vector<1x1x8x128xf32> to vector<8x128xf32>
    %212 = arith.addf %211, %206 : vector<8x128xf32>
    %c0_141 = arith.constant 0 : index
    %c3_142 = arith.constant 3 : index
    %c0_143 = arith.constant 0 : index
    %c0_144 = arith.constant 0 : index
    %213 = vector.load %arg6[%c0_141, %c3_142, %c0_143, %c0_144] : memref<1x4x8x128xf32, #tpu.memory_space<vmem>>, vector<1x1x8x128xf32>
    %214 = vector.shape_cast %213 : vector<1x1x8x128xf32> to vector<8x128xf32>
    %215 = vector.shape_cast %212 : vector<8x128xf32> to vector<1x1x8x128xf32>
    tpu.vector_store %arg6[%c0_141, %c3_142, %c0_143, %c0_144], %215 {strides = array<i32>} : memref<1x4x8x128xf32, #tpu.memory_space<vmem>>, vector<1x1x8x128xf32>,
    %c0_145 = arith.constant 0 : index
    %c3_146 = arith.constant 3 : index
    %c0_147 = arith.constant 0 : index
    %c0_148 = arith.constant 0 : index
    %216 = vector.load %arg7[%c0_145, %c3_146, %c0_147, %c0_148] : memref<1x4x8x128xf32, #tpu.memory_space<vmem>>, vector<1x1x8x128xf32>
    %217 = vector.shape_cast %216 : vector<1x1x8x128xf32> to vector<8x128xf32>
    %218 = arith.addf %217, %207 : vector<8x128xf32>
    %c0_149 = arith.constant 0 : index
    %c3_150 = arith.constant 3 : index
    %c0_151 = arith.constant 0 : index
    %c0_152 = arith.constant 0 : index
    %219 = vector.load %arg7[%c0_149, %c3_150, %c0_151, %c0_152] : memref<1x4x8x128xf32, #tpu.memory_space<vmem>>, vector<1x1x8x128xf32>
    %220 = vector.shape_cast %219 : vector<1x1x8x128xf32> to vector<8x128xf32>
    %221 = vector.shape_cast %218 : vector<8x128xf32> to vector<1x1x8x128xf32>
    tpu.vector_store %arg7[%c0_149, %c3_150, %c0_151, %c0_152], %221 {strides = array<i32>} : memref<1x4x8x128xf32, #tpu.memory_space<vmem>>, vector<1x1x8x128xf32>,
    %c0_153 = arith.constant 0 : index
    %c3_154 = arith.constant 3 : index
    %c0_155 = arith.constant 0 : index
    %c0_156 = arith.constant 0 : index
    %222 = vector.load %arg8[%c0_153, %c3_154, %c0_155, %c0_156] : memref<1x4x8x128xf32, #tpu.memory_space<vmem>>, vector<1x1x8x128xf32>
    %223 = vector.shape_cast %222 : vector<1x1x8x128xf32> to vector<8x128xf32>
    %224 = arith.addf %223, %208 : vector<8x128xf32>
    %c0_157 = arith.constant 0 : index
    %c3_158 = arith.constant 3 : index
    %c0_159 = arith.constant 0 : index
    %c0_160 = arith.constant 0 : index
    %225 = vector.load %arg8[%c0_157, %c3_158, %c0_159, %c0_160] : memref<1x4x8x128xf32, #tpu.memory_space<vmem>>, vector<1x1x8x128xf32>
    %226 = vector.shape_cast %225 : vector<1x1x8x128xf32> to vector<8x128xf32>
    %227 = vector.shape_cast %224 : vector<8x128xf32> to vector<1x1x8x128xf32>
    tpu.vector_store %arg8[%c0_157, %c3_158, %c0_159, %c0_160], %227 {strides = array<i32>} : memref<1x4x8x128xf32, #tpu.memory_space<vmem>>, vector<1x1x8x128xf32>,
    %c0_161 = arith.constant 0 : index
    %c3_162 = arith.constant 3 : index
    %c0_163 = arith.constant 0 : index
    %c0_164 = arith.constant 0 : index
    %228 = vector.load %arg9[%c0_161, %c3_162, %c0_163, %c0_164] : memref<1x4x8x128xf32, #tpu.memory_space<vmem>>, vector<1x1x8x128xf32>
    %229 = vector.shape_cast %228 : vector<1x1x8x128xf32> to vector<8x128xf32>
    %230 = arith.addf %229, %209 : vector<8x128xf32>
    %c0_165 = arith.constant 0 : index
    %c3_166 = arith.constant 3 : index
    %c0_167 = arith.constant 0 : index
    %c0_168 = arith.constant 0 : index
    %231 = vector.load %arg9[%c0_165, %c3_166, %c0_167, %c0_168] : memref<1x4x8x128xf32, #tpu.memory_space<vmem>>, vector<1x1x8x128xf32>
    %232 = vector.shape_cast %231 : vector<1x1x8x128xf32> to vector<8x128xf32>
    %233 = vector.shape_cast %230 : vector<8x128xf32> to vector<1x1x8x128xf32>
    tpu.vector_store %arg9[%c0_165, %c3_166, %c0_167, %c0_168], %233 {strides = array<i32>} : memref<1x4x8x128xf32, #tpu.memory_space<vmem>>, vector<1x1x8x128xf32>,
    %c0_169 = arith.constant 0 : index
    %c0_170 = arith.constant 0 : index
    %c0_171 = arith.constant 0 : index
    %c0_172 = arith.constant 0 : index
    %234 = vector.load %arg3[%c0_169, %c0_170, %c0_171, %c0_172] : memref<1x2x8x128xf32, #tpu.memory_space<vmem>>, vector<1x2x8x128xf32>
    %235 = vector.shape_cast %234 : vector<1x2x8x128xf32> to vector<2x8x128xf32>
    %c0_173 = arith.constant 0 : index
    %c0_174 = arith.constant 0 : index
    %c0_175 = arith.constant 0 : index
    %c0_176 = arith.constant 0 : index
    %236 = vector.load %arg4[%c0_173, %c0_174, %c0_175, %c0_176] : memref<1x2x8x128xf32, #tpu.memory_space<vmem>>, vector<1x2x8x128xf32>
    %237 = vector.shape_cast %236 : vector<1x2x8x128xf32> to vector<2x8x128xf32>
    %cst_177 = arith.constant 0.000000e+00 : f32
    %238 = vector.broadcast %cst_177 : f32 to vector<8x128xf32>
    %239 = arith.cmpf ogt, %4, %238 : vector<8x128xf32>
    %240 = arith.extui %239 : vector<8x128xi1> to vector<8x128xi32>
    %241 = arith.sitofp %240 : vector<8x128xi32> to vector<8x128xf32>
    %242 = arith.subf %235, %237 : vector<2x8x128xf32>
    %243 = math.absf %242 : vector<2x8x128xf32>
    %cst_178 = arith.constant 1.000000e+00 : f32
    %244 = vector.broadcast %cst_178 : f32 to vector<2x8x128xf32>
    %245 = arith.cmpf olt, %243, %244 : vector<2x8x128xf32>
    %cst_179 = arith.constant 5.000000e-01 : f32
    %246 = vector.broadcast %cst_179 : f32 to vector<2x8x128xf32>
    %247 = arith.mulf %246, %242 : vector<2x8x128xf32>
    %248 = arith.mulf %247, %242 : vector<2x8x128xf32>
    %cst_180 = arith.constant 5.000000e-01 : f32
    %249 = vector.broadcast %cst_180 : f32 to vector<2x8x128xf32>
    %250 = arith.subf %243, %249 : vector<2x8x128xf32>
    %251 = arith.select %245, %248, %250 : vector<2x8x128xi1>, vector<2x8x128xf32>
    %cst_181 = arith.constant dense<0.000000e+00> : vector<8x128xf32>
    %252 = vector.multi_reduction <add>, %251, %cst_181 [0] : vector<2x8x128xf32> to vector<8x128xf32>
    %253 = arith.mulf %252, %241 : vector<8x128xf32>
    %254 = arith.mulf %235, %235 : vector<2x8x128xf32>
    %cst_182 = arith.constant dense<0.000000e+00> : vector<8x128xf32>
    %255 = vector.multi_reduction <add>, %254, %cst_182 [0] : vector<2x8x128xf32> to vector<8x128xf32>
    %256 = arith.mulf %237, %237 : vector<2x8x128xf32>
    %cst_183 = arith.constant dense<0.000000e+00> : vector<8x128xf32>
    %257 = vector.multi_reduction <add>, %256, %cst_183 [0] : vector<2x8x128xf32> to vector<8x128xf32>
    %258 = arith.mulf %235, %237 : vector<2x8x128xf32>
    %cst_184 = arith.constant dense<0.000000e+00> : vector<8x128xf32>
    %259 = vector.multi_reduction <add>, %258, %cst_184 [0] : vector<2x8x128xf32> to vector<8x128xf32>
    %260 = arith.mulf %259, %259 : vector<8x128xf32>
    %cst_185 = arith.constant 9.99999996E-13 : f32
    %261 = vector.broadcast %cst_185 : f32 to vector<8x128xf32>
    %262 = arith.addf %255, %261 : vector<8x128xf32>
    %cst_186 = arith.constant 9.99999996E-13 : f32
    %263 = vector.broadcast %cst_186 : f32 to vector<8x128xf32>
    %264 = arith.addf %257, %263 : vector<8x128xf32>
    %265 = arith.mulf %262, %264 : vector<8x128xf32>
    %266 = arith.divf %260, %265 : vector<8x128xf32>
    %cst_187 = arith.constant 1.000000e+00 : f32
    %267 = vector.broadcast %cst_187 : f32 to vector<8x128xf32>
    %268 = arith.subf %267, %266 : vector<8x128xf32>
    %269 = arith.mulf %268, %241 : vector<8x128xf32>
    %c0_188 = arith.constant 0 : index
    %c0_189 = arith.constant 0 : index
    %c0_190 = arith.constant 0 : index
    %c0_191 = arith.constant 0 : index
    %270 = vector.load %arg10[%c0_188, %c0_189, %c0_190, %c0_191] : memref<1x1x8x128xf32, #tpu.memory_space<vmem>>, vector<1x1x8x128xf32>
    %271 = vector.shape_cast %270 : vector<1x1x8x128xf32> to vector<8x128xf32>
    %272 = arith.addf %271, %253 : vector<8x128xf32>
    %c0_192 = arith.constant 0 : index
    %c0_193 = arith.constant 0 : index
    %c0_194 = arith.constant 0 : index
    %c0_195 = arith.constant 0 : index
    %273 = vector.load %arg10[%c0_192, %c0_193, %c0_194, %c0_195] : memref<1x1x8x128xf32, #tpu.memory_space<vmem>>, vector<1x1x8x128xf32>
    %274 = vector.shape_cast %273 : vector<1x1x8x128xf32> to vector<8x128xf32>
    %275 = vector.shape_cast %272 : vector<8x128xf32> to vector<1x1x8x128xf32>
    tpu.vector_store %arg10[%c0_192, %c0_193, %c0_194, %c0_195], %275 {strides = array<i32>} : memref<1x1x8x128xf32, #tpu.memory_space<vmem>>, vector<1x1x8x128xf32>,
    %c0_196 = arith.constant 0 : index
    %c0_197 = arith.constant 0 : index
    %c0_198 = arith.constant 0 : index
    %c0_199 = arith.constant 0 : index
    %276 = vector.load %arg11[%c0_196, %c0_197, %c0_198, %c0_199] : memref<1x1x8x128xf32, #tpu.memory_space<vmem>>, vector<1x1x8x128xf32>
    %277 = vector.shape_cast %276 : vector<1x1x8x128xf32> to vector<8x128xf32>
    %278 = arith.addf %277, %241 : vector<8x128xf32>
    %c0_200 = arith.constant 0 : index
    %c0_201 = arith.constant 0 : index
    %c0_202 = arith.constant 0 : index
    %c0_203 = arith.constant 0 : index
    %279 = vector.load %arg11[%c0_200, %c0_201, %c0_202, %c0_203] : memref<1x1x8x128xf32, #tpu.memory_space<vmem>>, vector<1x1x8x128xf32>
    %280 = vector.shape_cast %279 : vector<1x1x8x128xf32> to vector<8x128xf32>
    %281 = vector.shape_cast %278 : vector<8x128xf32> to vector<1x1x8x128xf32>
    tpu.vector_store %arg11[%c0_200, %c0_201, %c0_202, %c0_203], %281 {strides = array<i32>} : memref<1x1x8x128xf32, #tpu.memory_space<vmem>>, vector<1x1x8x128xf32>,
    %c0_204 = arith.constant 0 : index
    %c0_205 = arith.constant 0 : index
    %c0_206 = arith.constant 0 : index
    %c0_207 = arith.constant 0 : index
    %282 = vector.load %arg12[%c0_204, %c0_205, %c0_206, %c0_207] : memref<1x1x8x128xf32, #tpu.memory_space<vmem>>, vector<1x1x8x128xf32>
    %283 = vector.shape_cast %282 : vector<1x1x8x128xf32> to vector<8x128xf32>
    %284 = arith.addf %283, %269 : vector<8x128xf32>
    %c0_208 = arith.constant 0 : index
    %c0_209 = arith.constant 0 : index
    %c0_210 = arith.constant 0 : index
    %c0_211 = arith.constant 0 : index
    %285 = vector.load %arg12[%c0_208, %c0_209, %c0_210, %c0_211] : memref<1x1x8x128xf32, #tpu.memory_space<vmem>>, vector<1x1x8x128xf32>
    %286 = vector.shape_cast %285 : vector<1x1x8x128xf32> to vector<8x128xf32>
    %287 = vector.shape_cast %284 : vector<8x128xf32> to vector<1x1x8x128xf32>
    tpu.vector_store %arg12[%c0_208, %c0_209, %c0_210, %c0_211], %287 {strides = array<i32>} : memref<1x1x8x128xf32, #tpu.memory_space<vmem>>, vector<1x1x8x128xf32>,
    return
  }
  func.func @transform_0(%arg0: i32, %arg1: i32) -> (i32, i32, i32, i32) {
    %c0_i32 = arith.constant 0 : i32
    %c0_i32_0 = arith.constant 0 : i32
    %c0_i32_1 = arith.constant 0 : i32
    return %arg0, %c0_i32, %arg1, %c0_i32_0 : i32, i32, i32, i32
  }
  func.func @transform_1(%arg0: i32, %arg1: i32) -> (i32, i32, i32, i32) {
    %c0_i32 = arith.constant 0 : i32
    %c0_i32_0 = arith.constant 0 : i32
    %c0_i32_1 = arith.constant 0 : i32
    return %arg0, %c0_i32, %arg1, %c0_i32_0 : i32, i32, i32, i32
  }
  func.func @transform_2(%arg0: i32, %arg1: i32) -> (i32, i32, i32, i32) {
    %c0_i32 = arith.constant 0 : i32
    %c0_i32_0 = arith.constant 0 : i32
    %c0_i32_1 = arith.constant 0 : i32
    return %arg0, %c0_i32, %arg1, %c0_i32_0 : i32, i32, i32, i32
  }
  func.func @transform_3(%arg0: i32, %arg1: i32) -> (i32, i32, i32, i32) {
    %c0_i32 = arith.constant 0 : i32
    %c0_i32_0 = arith.constant 0 : i32
    %c0_i32_1 = arith.constant 0 : i32
    return %arg0, %c0_i32, %arg1, %c0_i32_0 : i32, i32, i32, i32
  }
  func.func @transform_4(%arg0: i32, %arg1: i32) -> (i32, i32, i32, i32) {
    %c0_i32 = arith.constant 0 : i32
    %c0_i32_0 = arith.constant 0 : i32
    %c0_i32_1 = arith.constant 0 : i32
    %c0_i32_2 = arith.constant 0 : i32
    return %arg0, %c0_i32, %c0_i32_0, %c0_i32_1 : i32, i32, i32, i32
  }
  func.func @transform_5(%arg0: i32, %arg1: i32) -> (i32, i32, i32, i32) {
    %c0_i32 = arith.constant 0 : i32
    %c0_i32_0 = arith.constant 0 : i32
    %c0_i32_1 = arith.constant 0 : i32
    %c0_i32_2 = arith.constant 0 : i32
    return %arg0, %c0_i32, %c0_i32_0, %c0_i32_1 : i32, i32, i32, i32
  }
  func.func @transform_6(%arg0: i32, %arg1: i32) -> (i32, i32, i32, i32) {
    %c0_i32 = arith.constant 0 : i32
    %c0_i32_0 = arith.constant 0 : i32
    %c0_i32_1 = arith.constant 0 : i32
    %c0_i32_2 = arith.constant 0 : i32
    return %arg0, %c0_i32, %c0_i32_0, %c0_i32_1 : i32, i32, i32, i32
  }
  func.func @transform_7(%arg0: i32, %arg1: i32) -> (i32, i32, i32, i32) {
    %c0_i32 = arith.constant 0 : i32
    %c0_i32_0 = arith.constant 0 : i32
    %c0_i32_1 = arith.constant 0 : i32
    %c0_i32_2 = arith.constant 0 : i32
    return %arg0, %c0_i32, %c0_i32_0, %c0_i32_1 : i32, i32, i32, i32
  }
  func.func @transform_8(%arg0: i32, %arg1: i32) -> (i32, i32, i32, i32) {
    %c0_i32 = arith.constant 0 : i32
    %c0_i32_0 = arith.constant 0 : i32
    %c0_i32_1 = arith.constant 0 : i32
    %c0_i32_2 = arith.constant 0 : i32
    return %arg0, %c0_i32, %c0_i32_0, %c0_i32_1 : i32, i32, i32, i32
  }
  func.func @transform_9(%arg0: i32, %arg1: i32) -> (i32, i32, i32, i32) {
    %c0_i32 = arith.constant 0 : i32
    %c0_i32_0 = arith.constant 0 : i32
    %c0_i32_1 = arith.constant 0 : i32
    %c0_i32_2 = arith.constant 0 : i32
    return %arg0, %c0_i32, %c0_i32_0, %c0_i32_1 : i32, i32, i32, i32
  }
  func.func @transform_10(%arg0: i32, %arg1: i32) -> (i32, i32, i32, i32) {
    %c0_i32 = arith.constant 0 : i32
    %c0_i32_0 = arith.constant 0 : i32
    %c0_i32_1 = arith.constant 0 : i32
    %c0_i32_2 = arith.constant 0 : i32
    return %arg0, %c0_i32, %c0_i32_0, %c0_i32_1 : i32, i32, i32, i32
  }
}

</mosaic_0001>

<bundles_post_ra>
// kernel: segment_offset_loss.1
= control target key start
LH: loop header
LB: loop body
LE: loop exit
PB: predicated region body
PF: predicated region fallthrough
CT: control target
= control target key end

     0   :  { %s1317_s13 = smov 0   ;;  %s1319_s14 = smov 0   ;;  %s1503_s0 = inlined_call_operand.vmem [shape: f32[2,4,8,128], index: 0, kind: input, shape index: {}]   ;;  %s1504_s1 = inlined_call_operand.vmem [shape: f32[2,2,8,128], index: 1, kind: input, shape index: {}]   ;;  %s1505_s2 = inlined_call_operand.vmem [shape: f32[2,2,8,128], index: 2, kind: input, shape index: {}]   ;;  %s1506_s3 = inlined_call_operand.vmem [shape: f32[2,1,8,128], index: 3, kind: input, shape index: {}]   ;;  %s1507_s4 = inlined_call_operand.vmem [shape: f32[2,4,8,128], index: 4, kind: output, shape index: {0}]   ;;  %s1508_s5 = inlined_call_operand.vmem [shape: f32[2,4,8,128], index: 5, kind: output, shape index: {1}]   ;;  %s1509_s6 = inlined_call_operand.vmem [shape: f32[2,4,8,128], index: 6, kind: output, shape index: {2}]   ;;  %s1510_s7 = inlined_call_operand.vmem [shape: f32[2,4,8,128], index: 7, kind: output, shape index: {3}]   ;;  %s1511_s8 = inlined_call_operand.vmem [shape: f32[2,1,8,128], index: 8, kind: output, shape index: {4}]   ;;  %s1512_s9 = inlined_call_operand.vmem [shape: f32[2,1,8,128], index: 9, kind: output, shape index: {5}]   ;;  %s1513_s10 = inlined_call_operand.vmem [shape: f32[2,1,8,128], index: 10, kind: output, shape index: {6}]  }
   0x1   :  { %s1321_s15 = smov 0  }
   0x2 LB: > { %s33_s16 = sadd.s32 1, %s1255_s14  ;;  %p1109_p0 = scmp.ge.s32.totalorder %s1259_s15, 1  ;;  %s1259_s15 = sphi %s1321_s15, %s21_s15   ;;  %s1255_s14 = sphi %s1319_s14, %s1519_s14   ;;  %s1251_s13 = sphi %s1317_s13, %s1518_s13  }
   0x3   : > { %p35_p1 = scmp.ge.s32.totalorder %s33_s16, 2  ;;  %p386_p2 = scmp.lt.s32.totalorder %s1259_s15, 3 }
   0x5   : > { %s1521_s16 = smov (%p35_p1, %s33_s16), 0  ;;  %p387_p3 = pnand %p1109_p0, %p386_p2 }
   0x6   : > { %p477_p4 = scmp.lt.s32.totalorder (!%p387_p3), %s1251_s13, 1  ;;  %v566_v0 = vlaneseq (!%p387_p3)  ;;  %v1261_v7 = vmov (!%p387_p3), 0.0  }
   0x7   : > { %390 = sbr.rel (%p387_p3) target bundleno = 62 (0x3e), region = 36 }
   0x8   : > { %v567_v1 = vshrl.u32 (!%p387_p3), %v566_v0, 7  ;;  %v571_v2 = vand.u32 (!%p387_p3), 127, %v566_v0 }
   0xa   : > { %v572_v3 = vmul.u32 (!%p387_p3), 128, %v567_v1 }
   0xc   : > { %v573_v4 = vadd.s32 (!%p387_p3), %v572_v3, %v571_v2 }
   0xe   : > { %s1523_s13 = smov (!%p477_p4, %s1251_s13), 1  ;;  %vm574_vm0 = vcmp.lt.s32.totalorder %v573_v4, 256 }
   0xf   : > { %s1338_s17 = sshll.u32 %s1523_s13, 3  ;;  %s1341_s18 = sshll.u32 %s1523_s13, 5  ;;  %v1353_v8 = vsel %vm574_vm0, 1.0, %v1261_v7 }
  0x10   : > { %s507_s21 = scalar_lea.vmem %s1506_s3, %s1338_s17  ;;  %s1351_s24 = scalar_lea.vmem %s1503_s0, %s1341_s18 }
  0x11   : > { %v563_v5 = vld [vmem:[%s507_s21] sm:$0xff]  ;;  %v1131_v10 = vld [vmem:[%s1351_s24 + $0x8] sm:$0xff]  ;;  %s1170_s25 = sshll.u32 %s1523_s13, 4  ;;  %v1142_v16 = vld [vmem:[%s1351_s24 + $0x10] sm:$0xff]  ;;  %s1377_s19 = scalar_lea.vmem %s1510_s7, %s1341_s18 }
  0x12   : > { %v1176_v6 = vtrunc.f32 %v563_v5  ;;  %v577_v9 = vld [vmem:[%s1351_s24] sm:$0xff]  ;;  %v623_v14 = vsub.f32 1.0, %v1131_v10  ;;  %v1133_v15 = vmul.f32 -1.442695, %v1131_v10  ;;  %vm748_vm1 = vcmp.gt.f32.partialorder %v563_v5, 0.0  ;;  %s492_s28 = scalar_lea.vmem %s1504_s1, %s1170_s25  ;;  %s500_s11 = scalar_lea.vmem %s1505_s2, %s1170_s25  ;;  %v1153_v25 = vld [vmem:[%s1351_s24 + $0x18] sm:$0xff] }
  0x13   : > { %1203 = vlog2.f32 %v577_v9  ;;  %v584_v12 = vsub.f32 1.0, %v577_v9  ;;  %v1130_v13 = vmul.f32 -1.442695, %v577_v9  ;;  %v666_v18 = vsub.f32 1.0, %v1142_v16  ;;  %v1387_v28 = vld [vmem:[%s492_s28] sm:$0xff]  ;;  %v1389_v29 = vld [vmem:[%s492_s28 + $0x8] sm:$0xff]  ;;  %s535_s22 = scalar_lea.vmem %s1512_s9, %s1338_s17  ;;  %s1445_s25 = scalar_lea.vmem %s1507_s4, %s1341_s18 }
  0x14   : > { %v1177_v11 = vcvt.f32.s32 %v1176_v6  ;;  %1205 = vlog2.f32 %v1131_v10  ;;  %v1371_v21 = vsel %vm748_vm1, 1.0, %v1261_v7  ;;  %v1144_v24 = vmul.f32 -1.442695, %v1142_v16  ;;  %v1391_v30 = vld [vmem:[%s500_s11] sm:$0xff]  ;;  %v1397_v33 = vld [vmem:[%s500_s11 + $0x8] sm:$0xff]  ;;  %s531_s28 = scalar_lea.vmem %s1511_s8, %s1338_s17  ;;  %s517_s11 = scalar_lea.vmem %s1508_s5, %s1341_s18 }
  0x15   : > { %1207 = vlog2.f32 %v584_v12  ;;  %v709_v27 = vsub.f32 1.0, %v1153_v25  ;;  %v1155_v32 = vmul.f32 -1.442695, %v1153_v25  ;;  %v751_v35 = vsub.f32 %v1387_v28, %v1391_v30  ;;  %789 = vst [vmem:[%s535_s22] sm:$0xff] %v1371_v21  ;;  %s539_s21 = scalar_lea.vmem %s1513_s10, %s1338_s17 }
  0x16   : > { %vm578_vm2 = vcmp.eq.s32.totalorder %v1177_v11, 0  ;;  %vm617_vm3 = vcmp.eq.s32.totalorder %v1177_v11, 1  ;;  %vm660_vm4 = vcmp.eq.s32.totalorder %v1177_v11, 2  ;;  %1209 = vpow2.f32 %v1130_v13 }
  0x17   : > { %v1359_v17 = vsel %vm578_vm2, 1.0, %v1261_v7  ;;  %v1363_v20 = vsel %vm617_vm3, 1.0, %v1261_v7  ;;  %1211 = vlog2.f32 %v623_v14  ;;  %v1381_v23 = vsel %vm660_vm4, 1.0, %v1261_v7 }
  0x18   : > { %v602_v19 = vmul.f32 %v1359_v17, %v1353_v8  ;;  %1213 = vpow2.f32 %v1133_v15  ;;  %v641_v22 = vmul.f32 %v1363_v20, %v1353_v8  ;;  %v684_v26 = vmul.f32 %v1381_v23, %v1353_v8 }
  0x19   : > { %1215 = vlog2.f32 %v1142_v16  ;;  %vm703_vm5 = vcmp.eq.s32.totalorder %v1177_v11, 3  ;;  %vm588_vm6 = vcmp.gt.f32.partialorder %v1359_v17, 0.5  ;;  %vm627_vm7 = vcmp.gt.f32.partialorder %v1363_v20, 0.5 }
  0x1a   : > { %1217 = vlog2.f32 %v666_v18  ;;  %614 = vst [vmem:[%s1377_s19] sm:$0xff] %v602_v19  ;;  %v1395_v31 = vsel %vm703_vm5, 1.0, %v1261_v7  ;;  %1141 = vst [vmem:[%s1377_s19 + $0x8] sm:$0xff] %v641_v22  ;;  %v752_v36 = vsub.f32 %v1389_v29, %v1397_v33  ;;  %v767_v38 = vmul.f32 %v1387_v28, %v1387_v28 }
  0x1b   : > { %1219 = vpow2.f32 %v1144_v24  ;;  %v727_v34 = vmul.f32 %v1395_v31, %v1353_v8  ;;  %1152 = vst [vmem:[%s1377_s19 + $0x10] sm:$0xff] %v684_v26  ;;  %v768_v39 = vmul.f32 %v1389_v29, %v1389_v29  ;;  %v1413_v40 = vmul.f32 %v1391_v30, %v1391_v30 }
  0x1c   : > { %1221 = vlog2.f32 %v1153_v25  ;;  %vm670_vm8 = vcmp.gt.f32.partialorder %v1381_v23, 0.5  ;;  %v753_v43 = vand.u32 2147483647, %v751_v35  ;;  %v754_v46 = vand.u32 2147483647, %v752_v36 }
  0x1d   : > { %v1204_v37 = vpop.eup %1203  ;;  %1223 = vlog2.f32 %v709_v27  ;;  %v757_v47 = vmul.f32 0.5, %v751_v35  ;;  %v758_v48 = vmul.f32 0.5, %v752_v36  ;;  %1163 = vst [vmem:[%s1377_s19 + $0x18] sm:$0xff] %v727_v34  ;;  %vm713_vm10 = vcmp.gt.f32.partialorder %v1395_v31, 0.5  ;;  %s522_s19 = scalar_lea.vmem %s1509_s6, %s1341_s18 }
  0x1e   : > { %v1206_v41 = vpop.eup %1205  ;;  %v582_v42 = vmul.f32 0.6931472, %v1204_v37  ;;  %1225 = vpow2.f32 %v1155_v32  ;;  %vm1417_vm9 = vcmp.lt.f32.partialorder %v753_v43, 1.0  ;;  %v1165_v53 = vadd.f32 -0.5, %v753_v43 }
  0x1f   : > { %v1208_v44 = vpop.eup %1207  ;;  %v621_v45 = vmul.f32 0.6931472, %v1206_v41  ;;  %vm1422_vm11 = vcmp.lt.f32.partialorder %v754_v46, 1.0  ;;  %v759_v58 = vmul.f32 %v757_v47, %v751_v35  ;;  %v760_v62 = vmul.f32 %v758_v48, %v752_v36 }
  0x20   : > { %v1210_v49 = vpop.eup %1209  ;;  %v583_v50 = vmax.f32 %v582_v42, -100.0  ;;  %v586_v51 = vmul.f32 0.6931472, %v1208_v44  ;;  %v1166_v63 = vadd.f32 -0.5, %v754_v46  ;;  %v771_v3 = vmul.f32 %v1397_v33, %v1397_v33 }
  0x21   : > { %v1212_v54 = vpop.eup %1211  ;;  %v594_v55 = vadd.f32 1.0, %v1210_v49  ;;  %v622_v56 = vmax.f32 %v621_v45, -100.0  ;;  %v763_v2 = vsel %vm1417_vm9, %v759_v58, %v1165_v53  ;;  %v769_v35 = vadd.f32 %v768_v39, %v767_v38 }
  0x22   : > { %v1214_v59 = vpop.eup %1213  ;;  %v587_v60 = vmax.f32 %v586_v51, -100.0  ;;  %v625_v61 = vmul.f32 0.6931472, %v1212_v54  ;;  %v764_v9 = vsel %vm1422_vm11, %v760_v62, %v1166_v63  ;;  %v772_v45 = vadd.f32 %v771_v3, %v1413_v40 }
  0x23   : > { %v1216_v0 = vpop.eup %1215  ;;  %1227 = vrcp.f32 %v594_v55  ;;  %v633_v1 = vadd.f32 1.0, %v1214_v59  ;;  %v765_v13 = vadd.f32 %v764_v9, %v763_v2  ;;  %v777_v39 = vadd.f32 1e-12, %v769_v35 }
  0x24   : > { %v1218_v4 = vpop.eup %1217  ;;  %v589_v5 = vsel %vm588_vm6, %v583_v50, %v587_v60  ;;  %v626_v6 = vmax.f32 %v625_v61, -100.0  ;;  %v664_v7 = vmul.f32 0.6931472, %v1216_v0  ;;  %v778_v49 = vadd.f32 1e-12, %v772_v45 }
  0x25   : > { %v1220_v10 = vpop.eup %1219  ;;  %v590_v11 = vsub.f32 0.0, %v589_v5  ;;  %1229 = vrcp.f32 %v633_v1  ;;  %v668_v12 = vmul.f32 0.6931472, %v1218_v4  ;;  %v766_v34 = vmul.f32 %v1371_v21, %v765_v13 }
  0x26   : > { %v1222_v14 = vpop.eup %1221  ;;  %v628_v15 = vsel %vm627_vm7, %v622_v56, %v626_v6  ;;  %v665_v16 = vmax.f32 %v664_v7, -100.0  ;;  %v676_v18 = vadd.f32 1.0, %v1220_v10  ;;  %v773_v53 = vmul.f32 %v1391_v30, %v1387_v28 }
  0x27   : > { %v1224_v19 = vpop.eup %1223  ;;  %v599_v22 = vmul.f32 %v1353_v8, %v590_v11  ;;  %v629_v24 = vsub.f32 0.0, %v628_v15  ;;  %v669_v25 = vmax.f32 %v668_v12, -100.0  ;;  %v707_v26 = vmul.f32 0.6931472, %v1222_v14  ;;  %786 = vst [vmem:[%s531_s28] sm:$0xff] %v766_v34 }
  0x28   : > { %v1226_v27 = vpop.eup %1225  ;;  %1231 = vrcp.f32 %v676_v18  ;;  %v711_v32 = vmul.f32 0.6931472, %v1224_v19  ;;  %v774_v54 = vmul.f32 %v1397_v33, %v1389_v29  ;;  %v779_v55 = vmul.f32 %v778_v49, %v777_v39 }
  0x29   : > { %v638_v36 = vmul.f32 %v1353_v8, %v629_v24  ;;  %v671_v37 = vsel %vm670_vm8, %v665_v16, %v669_v25  ;;  %v708_v41 = vmax.f32 %v707_v26, -100.0  ;;  %v719_v44 = vadd.f32 1.0, %v1226_v27  ;;  %605 = vst [vmem:[%s1445_s25] sm:$0xff] %v599_v22 }
  0x2a   : > { %v672_v42 = vsub.f32 0.0, %v671_v37  ;;  %v712_v43 = vmax.f32 %v711_v32, -100.0 }
  0x2b   : > { %1233 = vrcp.f32 %v719_v44  ;;  %1135 = vst [vmem:[%s1445_s25 + $0x8] sm:$0xff] %v638_v36 }
  0x2c   : > { %v681_v46 = vmul.f32 %v1353_v8, %v672_v42  ;;  %v714_v38 = vsel %vm713_vm10, %v708_v41, %v712_v43  ;;  %1235 = vrcp.f32 %v779_v55 }
  0x2d   : > { %v1228_v47 = vpop.eup %1227  ;;  %v715_v48 = vsub.f32 0.0, %v714_v38 }
  0x2e   : > { %v597_v50 = vmul.f32 %v1228_v47, %v1359_v17  ;;  %v598_v51 = vmul.f32 %v1228_v47, %v1228_v47  ;;  %1146 = vst [vmem:[%s1445_s25 + $0x10] sm:$0xff] %v681_v46 }
  0x2f   : > { %v1230_v52 = vpop.eup %1229  ;;  %v724_v40 = vmul.f32 %v1353_v8, %v715_v48 }
  0x30   : > { %v600_v56 = vmul.f32 %v1353_v8, %v597_v50  ;;  %v601_v57 = vmul.f32 %v1353_v8, %v598_v51  ;;  %v636_v58 = vmul.f32 %v1230_v52, %v1363_v20  ;;  %v637_v59 = vmul.f32 %v1230_v52, %v1230_v52 }
  0x31   : > { %1157 = vst [vmem:[%s1445_s25 + $0x18] sm:$0xff] %v724_v40  ;;  %v775_v20 = vadd.f32 %v774_v54, %v773_v53 }
  0x32   : > { %v1232_v17 = vpop.eup %1231  ;;  %v639_v28 = vmul.f32 %v1353_v8, %v636_v58  ;;  %v640_v29 = vmul.f32 %v1353_v8, %v637_v59  ;;  %608 = vst [vmem:[%s517_s11] sm:$0xff] %v600_v56  ;;  %611 = vst [vmem:[%s522_s19] sm:$0xff] %v601_v57 }
  0x33   : > { %v679_v30 = vmul.f32 %v1232_v17, %v1381_v23  ;;  %v680_v33 = vmul.f32 %v1232_v17, %v1232_v17  ;;  %v776_v1 = vmul.f32 %v775_v20, %v775_v20 }
  0x34   : > { %1137 = vst [vmem:[%s517_s11 + $0x8] sm:$0xff] %v639_v28  ;;  %1139 = vst [vmem:[%s522_s19 + $0x8] sm:$0xff] %v640_v29 }
  0x35   : > { %v682_v60 = vmul.f32 %v1353_v8, %v679_v30  ;;  %v683_v61 = vmul.f32 %v1353_v8, %v680_v33  ;;  %v1234_v62 = vpop.eup %1233 }
  0x36   : > { %v722_v63 = vmul.f32 %v1234_v62, %v1395_v31  ;;  %v723_v0 = vmul.f32 %v1234_v62, %v1234_v62  ;;  %v1236_v3 = vpop.eup %1235 }
  0x37   : > { %1148 = vst [vmem:[%s517_s11 + $0x10] sm:$0xff] %v682_v60  ;;  %1150 = vst [vmem:[%s522_s19 + $0x10] sm:$0xff] %v683_v61  ;;  %v781_v4 = vmul.f32 %v1236_v3, %v776_v1 }
  0x38   : > { %v725_v23 = vmul.f32 %v1353_v8, %v722_v63  ;;  %v726_v2 = vmul.f32 %v1353_v8, %v723_v0 }
  0x39   : > { %v782_v5 = vsub.f32 1.0, %v781_v4 }
  0x3a   : > { %1159 = vst [vmem:[%s517_s11 + $0x18] sm:$0xff] %v725_v23  ;;  %1161 = vst [vmem:[%s522_s19 + $0x18] sm:$0xff] %v726_v2 }
  0x3b   : > { %v783_v6 = vmul.f32 %v1371_v21, %v782_v5 }
  0x3d   : > { %792 = vst [vmem:[%s539_s21] sm:$0xff] %v783_v6 }
  0x3e PF: > { %s21_s15 = sadd.s32 1, %s1259_s15   ;;  %s1518_s13 = smov %s1255_s14 }
  0x3f   : > { %p18_p5 = scmp.ge.s32.totalorder %s21_s15, 4   ;;  %s1519_s14 = smov %s1521_s16 }
  0x41   :  { %20 = sbr.rel (!%p18_p5) target bundleno = 2 (0x2), region = 166 }

</bundles_post_ra>
